<compile_context>
chip_gen: v7x
topology: tpu7x:2x2x1
jax: 0.10.0
libtpu: 0.0.40
codegen_flags: <defaults>
</compile_context>

<pallas_src>
import functools

import jax
import jax.numpy as jnp
from jax.experimental import pallas as pl
from jax.experimental.pallas import tpu as pltpu

LANE = 128


def _round_up(x, m):
    return ((x + m - 1) // m) * m


def _slab_layout(kc, t_w, fp, hp):
    """8-row-aligned section offsets inside the packed parameter slab."""
    offsets = []
    off = 0
    for rows in (kc, 1, t_w, fp, 1, hp, 1):   # w_conv, b_conv, mask, lw1, lb1, lw2, lb2
        offsets.append(off)
        off += _round_up(rows, 8)
    return tuple(offsets), off


# ----------------------------- Pallas kernel --------------------------------

def _make_kernel(batch, t_w, kc, fp, hp, sections):
    wc_s, bc_s, mk_s, w1_s, b1_s, w2_s, b2_s = sections

    def kernel(cols_ref, slab_ref, out_ref):
        # Static, 8-row-aligned views into the packed parameter slab.
        w_conv = slab_ref[wc_s:wc_s + kc, :]      # (kc, 128) fused conv weight
        b_conv = slab_ref[bc_s:bc_s + 1, :]       # (1, 128)  fused conv bias
        mask = slab_ref[mk_s:mk_s + t_w, :]       # (T, 128)  window validity
        lw1 = slab_ref[w1_s:w1_s + fp, :]         # (128, 128)
        lb1 = slab_ref[b1_s:b1_s + 1, :]          # (1, 128)
        lw2 = slab_ref[w2_s:w2_s + hp, :]         # (128, 128)
        lb2 = slab_ref[b2_s:b2_s + 1, :]          # (1, 128)  (-1e30 in pad lanes)

        # Fused conv: one (B*T, 128) @ (128, 128) MXU matmul covers all three
        # kernel sizes (their taps/channels packed into the fused weight).
        conv = jnp.dot(cols_ref[...], w_conv, preferred_element_type=jnp.float32)
        conv = jnp.maximum(conv + b_conv, 0.0)                 # bias + ReLU

        # Zero invalid windows (those that touch the time padding), then
        # max-pool over time with a single reshape + reduce (no unrolled loop).
        conv = conv.reshape(batch, t_w, fp) * mask[None, :, :]
        feat = jnp.max(conv, axis=1)                           # (B, 128)

        # dropout == identity (eval mode)
        h = jnp.dot(feat, lw1, preferred_element_type=jnp.float32)
        h = jnp.maximum(h + lb1, 0.0)                          # linear1 + ReLU
        logits = jnp.dot(h, lw2, preferred_element_type=jnp.float32) + lb2

        m = jnp.max(logits, axis=1, keepdims=True)             # softmax(dim=1)
        e = jnp.exp(logits - m)
        denom = jnp.sum(e, axis=1, keepdims=True)
        out_ref[...] = (e * pl.reciprocal(denom, approx=True)).astype(out_ref.dtype)

    return kernel


# --------------------------- parameter fusion (once) -------------------------

def build_param_slab(params, kernel_sizes, max_len):
    """Pack fused conv weights/bias, window mask and MLP weights into one
    lane-dense (rows, 128) f32 slab.  Depends only on params -> build once."""
    kernel_sizes = tuple(int(k) for k in kernel_sizes)
    d = (params["embed_word"].shape[1]
         + params["embed_entpos"].shape[1]
         + params["embed_numpos"].shape[1])
    n = len(kernel_sizes)
    f = params["conv_w"][0].shape[-1]
    hid = params["lin1_w"].shape[-1]
    out = params["lin2_w"].shape[-1]
    ks_max = max(kernel_sizes)
    l = int(max_len)
    t_w = l
    kc = ks_max * d
    fp = _round_up(n * f, LANE)
    hp = _round_up(hid, LANE)
    op = _round_up(out, LANE)
    assert fp == LANE and hp == LANE and op == LANE, "slab layout assumes 128-lane sections"

    sections, total_rows = _slab_layout(kc, t_w, fp, hp)
    wc_s, bc_s, mk_s, w1_s, b1_s, w2_s, b2_s = sections

    slab = jnp.zeros((total_rows, LANE), jnp.float32)
    t_idx = jnp.arange(t_w, dtype=jnp.int32)
    for g, ks in enumerate(kernel_sizes):
        wg = params["conv_w"][g].astype(jnp.float32).reshape(ks * d, f)
        slab = slab.at[wc_s:wc_s + ks * d, g * f:(g + 1) * f].set(wg)
        slab = slab.at[bc_s, g * f:(g + 1) * f].set(
            params["conv_b"][g].astype(jnp.float32).reshape(f))
        valid = (t_idx <= (l - ks)).astype(jnp.float32)          # (T,)
        slab = slab.at[mk_s:mk_s + t_w, g * f:(g + 1) * f].set(
            jnp.broadcast_to(valid[:, None], (t_w, f)))

    slab = slab.at[w1_s:w1_s + n * f, :hid].set(params["lin1_w"].astype(jnp.float32))
    slab = slab.at[b1_s, :hid].set(params["lin1_b"].astype(jnp.float32).reshape(hid))
    slab = slab.at[w2_s:w2_s + hid, :out].set(params["lin2_w"].astype(jnp.float32))
    # -1e30 in padded logit lanes -> exp underflows to 0 inside the softmax.
    slab = slab.at[b2_s, :].set(jnp.full((LANE,), -1e30, jnp.float32))
    slab = slab.at[b2_s, :out].set(params["lin2_b"].astype(jnp.float32).reshape(out))
    return slab


# --------------------------------- wrapper -----------------------------------

@functools.partial(jax.jit, static_argnames=("kernel_sizes", "label_size"))
def conv_relation_extractor_pallas(sent, ent_pos, num_pos,
                                   embed_word, embed_entpos, embed_numpos,
                                   slab, kernel_sizes, label_size):
    kernel_sizes = tuple(int(k) for k in kernel_sizes)

    # Embedding gathers + concat: plain-JAX glue (layout plumbing only).
    we = embed_word[sent]        # (B, L, word_dim)
    ee = embed_entpos[ent_pos]   # (B, L, pos_dim)
    ne = embed_numpos[num_pos]   # (B, L, pos_dim)
    x = jnp.concatenate([we, ee, ne], axis=2).astype(jnp.float32)   # (B, L, D)

    b, l, d = x.shape
    ks_max = max(kernel_sizes)
    kc = ks_max * d                      # fused contraction depth (=128 here)
    t_w = l                              # windows per sequence (time-zero-padded)
    fp = hp = op = LANE
    sections, total_rows = _slab_layout(kc, t_w, fp, hp)
    assert slab.shape == (total_rows, LANE)

    # im2col: (B*T, ks_max*D), zero time-pad on the right.
    x_pad = jnp.pad(x, ((0, 0), (0, ks_max - 1), (0, 0)))            # (B, L+ks-1, D)
    cols = jnp.concatenate([x_pad[:, k:k + t_w, :] for k in range(ks_max)],
                           axis=-1)                                  # (B, T, kc)
    cols = cols.reshape(b * t_w, kc)                                 # (B*T, kc)

    vmem = pl.BlockSpec(memory_space=pltpu.MemorySpace.VMEM)
    probs_padded = pl.pallas_call(
        _make_kernel(b, t_w, kc, fp, hp, sections),
        out_shape=jax.ShapeDtypeStruct((b, op), jnp.float32),
        in_specs=[vmem, vmem],          # whole-array VMEM blocks, no grid/pipeline
        out_specs=vmem,                 # lane-dense (B, 128) output block
    )(cols, slab)

    return probs_padded[:, :label_size]


# ----------------------------- pure-JAX reference ----------------------------

def conv_relation_extractor_ref(sent, ent_pos, num_pos, params, kernel_sizes):
    we = params["embed_word"][sent]
    ee = params["embed_entpos"][ent_pos]
    ne = params["embed_numpos"][num_pos]
    x = jnp.concatenate([we, ee, ne], axis=2).astype(jnp.float32)    # (B, L, D)
    _, l, _ = x.shape
    pooled = []
    for ks_i, ks in enumerate(kernel_sizes):
        w = params["conv_w"][ks_i]          # (ks, D, F)
        bcv = params["conv_b"][ks_i]        # (1, F)
        l_out = l - ks + 1
        acc = 0.0
        for k in range(ks):
            acc = acc + jnp.einsum("bld,df->blf", x[:, k:k + l_out, :], w[k])
        acc = jax.nn.relu(acc + bcv[None, :, :])
        pooled.append(jnp.max(acc, axis=1))  # (B, F)
    feat = jnp.concatenate(pooled, axis=1)
    h = jax.nn.relu(feat @ params["lin1_w"] + params["lin1_b"])
    logits = h @ params["lin2_w"] + params["lin2_b"]
    return jax.nn.softmax(logits, axis=1)


# ----------------------------------- main ------------------------------------

if __name__ == "__main__":
    # Config (small, consistent with the module's __init__):
    word_embed_dim = 24
    pos_embed_dim = 4
    total_embed_dim = word_embed_dim + 2 * pos_embed_dim   # 32
    filter_num = 8
    kernel_sizes = (2, 3, 4)
    free_layer_size = 16
    label_size = 5
    max_len = 16
    word_vocab = 50
    entpos_size = 32
    numpos_size = 32
    batch = 2

    key = jax.random.PRNGKey(0)
    keys = jax.random.split(key, 16)

    params = {
        "embed_word": 0.1 * jax.random.normal(
            keys[0], (word_vocab, word_embed_dim), jnp.float32),
        "embed_entpos": 0.1 * jax.random.normal(
            keys[1], (entpos_size, pos_embed_dim), jnp.float32),
        "embed_numpos": 0.1 * jax.random.normal(
            keys[2], (numpos_size, pos_embed_dim), jnp.float32),
        # conv weights stored as (ks, D, F)  (PyTorch layout is (F, 1, ks, D))
        "conv_w": [
            0.1 * jax.random.normal(
                keys[3 + i], (kernel_sizes[i], total_embed_dim, filter_num),
                jnp.float32)
            for i in range(len(kernel_sizes))
        ],
        "conv_b": [
            0.05 * jax.random.normal(keys[6 + i], (1, filter_num), jnp.float32)
            for i in range(len(kernel_sizes))
        ],
        "lin1_w": 0.1 * jax.random.normal(
            keys[9], (len(kernel_sizes) * filter_num, free_layer_size),
            jnp.float32),
        "lin1_b": 0.05 * jax.random.normal(
            keys[10], (1, free_layer_size), jnp.float32),
        "lin2_w": 0.1 * jax.random.normal(
            keys[11], (free_layer_size, label_size), jnp.float32),
        "lin2_b": 0.05 * jax.random.normal(
            keys[12], (1, label_size), jnp.float32),
    }

    sent = jax.random.randint(keys[13], (batch, max_len), 0, word_vocab, jnp.int32)
    ent_pos = jax.random.randint(keys[14], (batch, max_len), 0, entpos_size, jnp.int32)
    num_pos = jax.random.randint(keys[15], (batch, max_len), 0, numpos_size, jnp.int32)

    # Fused / padded parameter slab is built ONCE and reused across calls.
    slab = jax.block_until_ready(build_param_slab(params, kernel_sizes, max_len))

    out = conv_relation_extractor_pallas(
        sent, ent_pos, num_pos,
        params["embed_word"], params["embed_entpos"], params["embed_numpos"],
        slab, kernel_sizes, label_size)
    out = jax.block_until_ready(out)

    ref = conv_relation_extractor_ref(sent, ent_pos, num_pos, params,
                                      kernel_sizes)
    assert out.shape == (batch, label_size)
    # f32 accumulation throughout; tolerance covers accumulation-order
    # differences of the fused 128-deep matmul and the EUP approx reciprocal
    # used in the softmax epilogue.
    assert jnp.allclose(out, ref, atol=2e-3, rtol=2e-3), (out, ref)
    assert jnp.allclose(jnp.sum(out, axis=1), 1.0, atol=5e-3)

    print("KERNEL_OK")
</pallas_src>

<mosaic_0001>
module attributes {stable_mosaic.version = 11 : i64} {
  func.func @kernel(%arg0: memref<32x128xf32, #tpu.memory_space<vmem>>, %arg1: memref<424x128xf32, #tpu.memory_space<vmem>>, %arg2: memref<2x128xf32, #tpu.memory_space<vmem>>) attributes {dimension_semantics = [], scalar_prefetch = 0 : i64, scratch_operands = 0 : i64, tpu.core_type = #tpu.core_type<tc>} {
    %c0 = arith.constant 0 : index
    %c0_0 = arith.constant 0 : index
    %0 = vector.load %arg1[%c0, %c0_0] : memref<424x128xf32, #tpu.memory_space<vmem>>, vector<128x128xf32>
    %c128 = arith.constant 128 : index
    %c0_1 = arith.constant 0 : index
    %1 = vector.load %arg1[%c128, %c0_1] : memref<424x128xf32, #tpu.memory_space<vmem>>, vector<1x128xf32>
    %c136 = arith.constant 136 : index
    %c0_2 = arith.constant 0 : index
    %2 = vector.load %arg1[%c136, %c0_2] : memref<424x128xf32, #tpu.memory_space<vmem>>, vector<16x128xf32>
    %c152 = arith.constant 152 : index
    %c0_3 = arith.constant 0 : index
    %3 = vector.load %arg1[%c152, %c0_3] : memref<424x128xf32, #tpu.memory_space<vmem>>, vector<128x128xf32>
    %c280 = arith.constant 280 : index
    %c0_4 = arith.constant 0 : index
    %4 = vector.load %arg1[%c280, %c0_4] : memref<424x128xf32, #tpu.memory_space<vmem>>, vector<1x128xf32>
    %c288 = arith.constant 288 : index
    %c0_5 = arith.constant 0 : index
    %5 = vector.load %arg1[%c288, %c0_5] : memref<424x128xf32, #tpu.memory_space<vmem>>, vector<128x128xf32>
    %c416 = arith.constant 416 : index
    %c0_6 = arith.constant 0 : index
    %6 = vector.load %arg1[%c416, %c0_6] : memref<424x128xf32, #tpu.memory_space<vmem>>, vector<1x128xf32>
    %c0_7 = arith.constant 0 : index
    %c0_8 = arith.constant 0 : index
    %7 = vector.load %arg0[%c0_7, %c0_8] : memref<32x128xf32, #tpu.memory_space<vmem>>, vector<32x128xf32>
    %cst = arith.constant dense<0.000000e+00> : vector<32x128xf32>
    %8 = tpu.matmul %7, %0, %cst {dimension_numbers = #tpu.dot_dimension_numbers<[1], [0], [0], [1], [0, 0, 1, 1], [], []>} : vector<32x128xf32>, vector<128x128xf32>, vector<32x128xf32> -> vector<32x128xf32>
    %9 = vector.broadcast %1 : vector<1x128xf32> to vector<32x128xf32>
    %10 = arith.addf %8, %9 : vector<32x128xf32>
    %cst_9 = arith.constant 0.000000e+00 : f32
    %11 = vector.broadcast %cst_9 : f32 to vector<32x128xf32>
    %12 = arith.maximumf %10, %11 : vector<32x128xf32>
    %13 = vector.shape_cast %12 : vector<32x128xf32> to vector<2x16x128xf32>
    %14 = vector.shape_cast %2 : vector<16x128xf32> to vector<1x16x128xf32>
    %15 = vector.broadcast %14 : vector<1x16x128xf32> to vector<2x16x128xf32>
    %16 = arith.mulf %13, %15 : vector<2x16x128xf32>
    %cst_10 = arith.constant dense<0xFF800000> : vector<2x128xf32>
    %17 = vector.multi_reduction <maximumf>, %16, %cst_10 [1] : vector<2x16x128xf32> to vector<2x128xf32>
    %cst_11 = arith.constant dense<0.000000e+00> : vector<2x128xf32>
    %18 = tpu.matmul %17, %3, %cst_11 {dimension_numbers = #tpu.dot_dimension_numbers<[1], [0], [0], [1], [0, 0, 1, 1], [], []>} : vector<2x128xf32>, vector<128x128xf32>, vector<2x128xf32> -> vector<2x128xf32>
    %19 = vector.broadcast %4 : vector<1x128xf32> to vector<2x128xf32>
    %20 = arith.addf %18, %19 : vector<2x128xf32>
    %cst_12 = arith.constant 0.000000e+00 : f32
    %21 = vector.broadcast %cst_12 : f32 to vector<2x128xf32>
    %22 = arith.maximumf %20, %21 : vector<2x128xf32>
    %cst_13 = arith.constant dense<0.000000e+00> : vector<2x128xf32>
    %23 = tpu.matmul %22, %5, %cst_13 {dimension_numbers = #tpu.dot_dimension_numbers<[1], [0], [0], [1], [0, 0, 1, 1], [], []>} : vector<2x128xf32>, vector<128x128xf32>, vector<2x128xf32> -> vector<2x128xf32>
    %24 = vector.broadcast %6 : vector<1x128xf32> to vector<2x128xf32>
    %25 = arith.addf %23, %24 : vector<2x128xf32>
    %cst_14 = arith.constant dense<0xFF800000> : vector<2xf32>
    %26 = vector.multi_reduction <maximumf>, %25, %cst_14 [1] : vector<2x128xf32> to vector<2xf32>
    %27 = vector.shape_cast %26 : vector<2xf32> to vector<2x1xf32>
    %28 = vector.broadcast %27 : vector<2x1xf32> to vector<2x128xf32>
    %29 = arith.subf %25, %28 : vector<2x128xf32>
    %30 = math.exp %29 : vector<2x128xf32>
    %cst_15 = arith.constant dense<0.000000e+00> : vector<2xf32>
    %31 = vector.multi_reduction <add>, %30, %cst_15 [1] : vector<2x128xf32> to vector<2xf32>
    %32 = vector.shape_cast %31 : vector<2xf32> to vector<2x1xf32>
    %33 = tpu.reciprocal %32 {approx = true} : vector<2x1xf32> -> vector<2x1xf32>
    %34 = vector.broadcast %33 : vector<2x1xf32> to vector<2x128xf32>
    %35 = arith.mulf %30, %34 : vector<2x128xf32>
    %c0_16 = arith.constant 0 : index
    %c0_17 = arith.constant 0 : index
    %36 = vector.load %arg2[%c0_16, %c0_17] : memref<2x128xf32, #tpu.memory_space<vmem>>, vector<2x128xf32>
    tpu.vector_store %arg2[%c0_16, %c0_17], %35 {strides = array<i32>} : memref<2x128xf32, #tpu.memory_space<vmem>>, vector<2x128xf32>,
    return
  }
}

</mosaic_0001>

<bundles_post_ra>
// kernel: conv_relation_extractor_pallas.1
= control target key start
LH: loop header
LB: loop body
LE: loop exit
PB: predicated region body
PF: predicated region fallthrough
CT: control target
= control target key end

     0   :  { %v638_v5 = vmov 0.0|0.0   ;;  %s856_s0 = inlined_call_operand.vmem [shape: f32[32,128], index: 0, kind: input, shape index: {}]   ;;  %s857_s1 = inlined_call_operand.vmem [shape: f32[424,128], index: 1, kind: input, shape index: {}]   ;;  %s858_s2 = inlined_call_operand.hbm [shape: f32[2,128], index: 2, kind: output, shape index: {}]  }
   0x1   :  { %v12_v0 = vld [vmem:[%s857_s1] sm:$0xff]  ;;  %v13_v1 = vld [vmem:[%s857_s1 + $0x8] sm:$0xff]  ;;  %v14_v2 = vld [vmem:[%s857_s1 + $0x10] sm:$0xff]  ;;  %558 = vmatprep.subr.bf16.mxu1 %v638_v5 }
   0x2   :  { %v526_v3 = vpack.c.bf16 %v13_v1, %v12_v0  ;;  %v15_v4 = vld [vmem:[%s857_s1 + $0x18] sm:$0xff]  ;;  %v16_v7 = vld [vmem:[%s857_s1 + $0x20] sm:$0xff]  ;;  %v17_v8 = vld [vmem:[%s857_s1 + $0x28] sm:$0xff] }
   0x3   :  { %v530_v6 = vpack.c.bf16 %v15_v4, %v14_v2  ;;  %v534_v9 = vpack.c.bf16 %v17_v8, %v16_v7  ;;  %v65_v10 = vld [vmem:[%s856_s0] sm:$0xff]  ;;  %v18_v11 = vld [vmem:[%s857_s1 + $0x30] sm:$0xff]  ;;  %v19_v12 = vld [vmem:[%s857_s1 + $0x38] sm:$0xff] }
   0x4   :  { %527 = vmatprep.subr.bf16.mxu0 %v526_v3  ;;  %450 = vmatprep.mubr.f32.mxu0 %v65_v10  ;;  %v31_v13 = vld [vmem:[%s857_s1 + $0x98] sm:$0xff]  ;;  %v32_v14 = vld [vmem:[%s857_s1 + $0xa0] sm:$0xff] }
   0x5   :  { %529 = vmatpush3.bf16.msra.mxu0 %v526_v3 }
   0x6   :  { %531 = vmatprep.subr.bf16.mxu0 %v530_v6 }
   0x7   :  { %7 = vsyncpa [#allocation3], 0  ;;  %v559_v15 = vpack.c.bf16 %v32_v14, %v31_v13  ;;  %v538_v16 = vpack.c.bf16 %v19_v12, %v18_v11  ;;  %v20_v17 = vld [vmem:[%s857_s1 + $0x40] sm:$0xff]  ;;  %v21_v18 = vld [vmem:[%s857_s1 + $0x48] sm:$0xff]  ;;  %vm639_vm0 = vmmov 0   ;;  %v640_v52 = vmov 0.0  }
   0x8   :  { %v542_v19 = vpack.c.bf16 %v21_v18, %v20_v17  ;;  %v22_v20 = vld [vmem:[%s857_s1 + $0x50] sm:$0xff]  ;;  %v23_v21 = vld [vmem:[%s857_s1 + $0x58] sm:$0xff]  ;;  %v24_v23 = vld [vmem:[%s857_s1 + $0x60] sm:$0xff]  ;;  %488 = vmatprep.mubr.msk.f32.mxu1 %vm639_vm0, %v640_v52  ;;  %vm186_vm1 = vcmask 1041409   ;;  %vm334_vm2 = vcmask 1041408   ;;  %s641_s8 = smov [#allocation2]  }
   0x9   :  { %533 = vmatpush3.bf16.msra.mxu0 %v530_v6  ;;  %560 = vmatpush3.bf16.msra.mxu1 %v559_v15  ;;  %v546_v22 = vpack.c.bf16 %v23_v21, %v22_v20  ;;  %v25_v24 = vld [vmem:[%s857_s1 + $0x68] sm:$0xff]  ;;  %v26_v26 = vld [vmem:[%s857_s1 + $0x70] sm:$0xff]  ;;  %v27_v27 = vld [vmem:[%s857_s1 + $0x78] sm:$0xff]  ;;  %s353_s9 = sshll.u32 %s641_s8, 4  ;;  %s354_s9 = int_to_ptr.vmem [resolvable:$true] %s353_s9 }
   0xa   :  { %535 = vmatprep.subr.bf16.mxu0 %v534_v9  ;;  %561 = vmatprep.subr.bf16.mxu1 %v638_v5  ;;  %v550_v25 = vpack.c.bf16 %v25_v24, %v24_v23  ;;  %v554_v28 = vpack.c.bf16 %v27_v27, %v26_v26  ;;  %v66_v29 = vld [vmem:[%s856_s0 + $0x8] sm:$0xff]  ;;  %v67_v30 = vld [vmem:[%s856_s0 + $0x10] sm:$0xff]  ;;  %v68_v31 = vld [vmem:[%s856_s0 + $0x18] sm:$0xff]  ;;  %p619_p1 = scmp.lt.s32.totalorder %s354_s9, %s354_s9 }
   0xb   :  { %v33_v32 = vld [vmem:[%s857_s1 + $0xa8] sm:$0xff]  ;;  %v34_v33 = vld [vmem:[%s857_s1 + $0xb0] sm:$0xff]  ;;  %v35_v35 = vld [vmem:[%s857_s1 + $0xb8] sm:$0xff] }
   0xc   :  { %v562_v34 = vpack.c.bf16 %v34_v33, %v33_v32  ;;  %v36_v36 = vld [vmem:[%s857_s1 + $0xc0] sm:$0xff]  ;;  %v37_v38 = vld [vmem:[%s857_s1 + $0xc8] sm:$0xff]  ;;  %v38_v39 = vld [vmem:[%s857_s1 + $0xd0] sm:$0xff] }
   0xd   :  { %537 = vmatpush3.bf16.msra.mxu0 %v534_v9  ;;  %v565_v37 = vpack.c.bf16 %v36_v36, %v35_v35  ;;  %v568_v40 = vpack.c.bf16 %v38_v39, %v37_v38  ;;  %v39_v41 = vld [vmem:[%s857_s1 + $0xd8] sm:$0xff]  ;;  %v40_v42 = vld [vmem:[%s857_s1 + $0xe0] sm:$0xff]  ;;  %v41_v44 = vld [vmem:[%s857_s1 + $0xe8] sm:$0xff] }
   0xe   :  { %539 = vmatprep.subr.bf16.mxu0 %v538_v16  ;;  %563 = vmatpush3.bf16.msra.mxu1 %v562_v34  ;;  %v571_v43 = vpack.c.bf16 %v40_v42, %v39_v41  ;;  %v42_v45 = vld [vmem:[%s857_s1 + $0xf0] sm:$0xff]  ;;  %v43_v47 = vld [vmem:[%s857_s1 + $0xf8] sm:$0xff]  ;;  %v44_v48 = vld [vmem:[%s857_s1 + $0x100] sm:$0xff] }
   0xf   :  { %564 = vmatprep.subr.bf16.mxu1 %v638_v5  ;;  %v574_v46 = vpack.c.bf16 %v42_v45, %v41_v44  ;;  %v577_v49 = vpack.c.bf16 %v44_v48, %v43_v47  ;;  %v45_v50 = vld [vmem:[%s857_s1 + $0x108] sm:$0xff]  ;;  %v46_v51 = vld [vmem:[%s857_s1 + $0x110] sm:$0xff]  ;;  %v48_v54 = vld [vmem:[%s857_s1 + $0x120] sm:$0xff] }
  0x10   :  { %v580_v53 = vpack.c.bf16 %v46_v51, %v45_v50  ;;  %v49_v55 = vld [vmem:[%s857_s1 + $0x128] sm:$0xff]  ;;  %v50_v56 = vld [vmem:[%s857_s1 + $0x130] sm:$0xff]  ;;  %v51_v58 = vld [vmem:[%s857_s1 + $0x138] sm:$0xff] }
  0x11   :  { %541 = vmatpush3.bf16.msra.mxu0 %v538_v16  ;;  %v583_v57 = vpack.c.bf16 %v49_v55, %v48_v54  ;;  %v586_v59 = vpack.c.bf16 %v51_v58, %v50_v56  ;;  %v52_v60 = vld [vmem:[%s857_s1 + $0x140] sm:$0xff]  ;;  %v53_v61 = vld [vmem:[%s857_s1 + $0x148] sm:$0xff]  ;;  %v54_v63 = vld [vmem:[%s857_s1 + $0x150] sm:$0xff] }
  0x12   :  { %543 = vmatprep.subr.bf16.mxu0 %v542_v19  ;;  %566 = vmatpush3.bf16.msra.mxu1 %v565_v37  ;;  %v589_v62 = vpack.c.bf16 %v53_v61, %v52_v60  ;;  %v55_v0 = vld [vmem:[%s857_s1 + $0x158] sm:$0xff]  ;;  %v56_v2 = vld [vmem:[%s857_s1 + $0x160] sm:$0xff]  ;;  %v57_v3 = vld [vmem:[%s857_s1 + $0x168] sm:$0xff] }
  0x13   :  { %567 = vmatprep.subr.bf16.mxu1 %v638_v5  ;;  %v592_v1 = vpack.c.bf16 %v55_v0, %v54_v63  ;;  %v595_v4 = vpack.c.bf16 %v57_v3, %v56_v2  ;;  %v58_v6 = vld [vmem:[%s857_s1 + $0x170] sm:$0xff]  ;;  %v59_v7 = vld [vmem:[%s857_s1 + $0x178] sm:$0xff]  ;;  %v60_v9 = vld [vmem:[%s857_s1 + $0x180] sm:$0xff] }
  0x14   :  { %v598_v8 = vpack.c.bf16 %v59_v7, %v58_v6  ;;  %v61_v10 = vld [vmem:[%s857_s1 + $0x188] sm:$0xff]  ;;  %v361_v12 = vld [vmem:[%s857_s1 + $0x80] ss:$0 sm:$0xff]  ;;  %v30_v16 = vld [vmem:[%s857_s1 + $0x90] sm:$0xff] }
  0x15   :  { %545 = vmatpush3.bf16.msra.mxu0 %v542_v19  ;;  %v601_v11 = vpack.c.bf16 %v61_v10, %v60_v9  ;;  %v29_v19 = vld [vmem:[%s857_s1 + $0x88] sm:$0xff]  ;;  %v62_v45 = vld [vmem:[%s857_s1 + $0x190] sm:$0xff]  ;;  %v362_v48 = vld [vmem:[%s857_s1 + $0x118] ss:$0 sm:$0xff] }
  0x16   :  { %547 = vmatprep.subr.bf16.mxu0 %v546_v22  ;;  %569 = vmatpush3.bf16.msra.mxu1 %v568_v40 }
  0x17   :  { %570 = vmatprep.subr.bf16.mxu1 %v638_v5 }
  0x19   :  { %549 = vmatpush3.bf16.msra.mxu0 %v546_v22 }
  0x1a   :  { %551 = vmatprep.subr.bf16.mxu0 %v550_v25  ;;  %572 = vmatpush3.bf16.msra.mxu1 %v571_v43 }
  0x1b   :  { %573 = vmatprep.subr.bf16.mxu1 %v638_v5 }
  0x1d   :  { %553 = vmatpush3.bf16.msra.mxu0 %v550_v25 }
  0x1e   :  { %555 = vmatprep.subr.bf16.mxu0 %v554_v28  ;;  %575 = vmatpush3.bf16.msra.mxu1 %v574_v46  ;;  %v63_v46 = vld [vmem:[%s857_s1 + $0x198] sm:$0xff] }
  0x1f   :  { %576 = vmatprep.subr.bf16.mxu1 %v638_v5  ;;  %v604_v47 = vpack.c.bf16 %v63_v46, %v62_v45 }
  0x21   :  { %557 = vmatpush3.bf16.msra.mxu0 %v554_v28 }
  0x22   :  { %582 = vmatprep.subr.bf16.mxu0 %v638_v5  ;;  %578 = vmatpush3.bf16.msra.mxu1 %v577_v49 }
  0x23   :  { %579 = vmatprep.subr.bf16.mxu1 %v638_v5 }
  0x24   :  { %451 = vmatmul.mubr.f32.vlgmr.msra.gmra.mrb[0].mxu0 %v66_v29 }
  0x25   :  { %453 = vmatprep.mubr.f32.mxu0 %v67_v30  ;;  %584 = vmatpush3.bf16.msra.mxu0 %v583_v57 }
  0x26   :  { %581 = vmatpush3.bf16.msra.mxu1 %v580_v53  ;;  %585 = vmatprep.subr.bf16.mxu0 %v638_v5  ;;  %v363_v53 = vld [vmem:[%s857_s1 + $0x1a0] ss:$0 sm:$0xff]  ;;  %s614_s1 = scalar_lea.vmem %s354_s9, 32 }
  0x27   :  { %p615_p0 = scmp.ne.s32.totalorder %s354_s9, %s614_s1  ;;  %p620_p2 = scmp.lt.s32.totalorder %s614_s1, %s614_s1 }
  0x28   :  { %454 = vmatmul.mubr.f32.gmra.mrb[2].mxu0 %v68_v31 }
  0x29   :  { %523 = vmatprep.mubr.msk.f32.mxu0 %vm639_vm0, %v640_v52  ;;  %587 = vmatpush3.bf16.msra.mxu0 %v586_v59  ;;  %p621_p3 = por %p620_p2, %p619_p1 }
  0x2a   :  { %588 = vmatprep.subr.bf16.mxu0 %v638_v5 }
  0x2b   :  { %p622_p4 = pnand %p621_p3, %p615_p0 }
  0x2d   :  { %590 = vmatpush3.bf16.msra.mxu0 %v589_v62 }
  0x2e   :  { %591 = vmatprep.subr.bf16.mxu0 %v638_v5 }
  0x31   :  { %593 = vmatpush3.bf16.msra.mxu0 %v592_v1 }
  0x32   :  { %594 = vmatprep.subr.bf16.mxu0 %v638_v5 }
  0x35   :  { %596 = vmatpush3.bf16.msra.mxu0 %v595_v4 }
  0x36   :  { %597 = vmatprep.subr.bf16.mxu0 %v638_v5 }
  0x39   :  { %599 = vmatpush3.bf16.msra.mxu0 %v598_v8 }
  0x3a   :  { %600 = vmatprep.subr.bf16.mxu0 %v638_v5 }
  0x3d   :  { %602 = vmatpush3.bf16.msra.mxu0 %v601_v11 }
  0x3e   :  { %603 = vmatprep.subr.bf16.mxu0 %v638_v5 }
  0x41   :  { %605 = vmatpush3.bf16.msra.mxu0 %v604_v47 }
  0xf7   :  { %v452_v13 = vpop.f32.mrb[0].mxu0 }
  0xf8   :  { %v145_v14 = vadd.f32 %v452_v13, %v361_v12  ;;  %v139_v15 = vpop.f32.mrb[1].mxu0 }
  0xf9   :  { %v140_v17 = vadd.f32 %v361_v12, %v139_v15 }
  0xfa   :  { %v159_v18 = vmax.f32 %v145_v14, 0.0 }
  0xfb   :  { %v158_v20 = vmax.f32 %v140_v17, 0.0  ;;  %v455_v21 = vpop.f32.mrb[2].mxu0 }
  0xfc   :  { %v163_v5 = vmul.f32 %v159_v18, %v30_v16  ;;  %v155_v22 = vadd.f32 %v455_v21, %v361_v12  ;;  %v149_v23 = vpop.f32.mrb[3].mxu0 }
  0xfd   :  { %v162_v24 = vmul.f32 %v158_v20, %v29_v19  ;;  %v150_v25 = vadd.f32 %v361_v12, %v149_v23 }
  0xfe   :  { %v161_v26 = vmax.f32 %v155_v22, 0.0 }
  0xff   :  { %v166_v27 = vmax.f32 %v162_v24, %v163_v5  ;;  %v160_v28 = vmax.f32 %v150_v25, 0.0 }
 0x100   :  { %v165_v29 = vmul.f32 %v161_v26, %v30_v16 }
 0x101   :  { %v167_v30 = vrot.slane %v166_v27, 4  ;;  %v164_v31 = vmul.f32 %v160_v28, %v29_v19 }
 0x103   :  { %v168_v32 = vmax.f32 %v166_v27, %v167_v30  ;;  %v173_v33 = vmax.f32 %v164_v31, %v165_v29 }
 0x105   :  { %v169_v34 = vrot.slane %v168_v32, 2  ;;  %v174_v35 = vrot.slane %v173_v33, 4 }
 0x107   :  { %v175_v36 = vmax.f32 %v173_v33, %v174_v35  ;;  %v170_v37 = vmax.f32 %v168_v32, %v169_v34 }
 0x109   :  { %v176_v38 = vrot.slane %v175_v36, 2  ;;  %v171_v39 = vrot.slane %v170_v37, 1 }
 0x10b   :  { %v177_v40 = vmax.f32 %v175_v36, %v176_v38  ;;  %v172_v42 = vmax.f32 %v170_v37, %v171_v39 }
 0x10d   :  { %v178_v41 = vrot.slane %v177_v40, 1 }
 0x10f   :  { %v179_v43 = vmax.f32 %v177_v40, %v178_v41 }
 0x111   :  { %v187_v44 = vsel %vm186_vm1, %v179_v43, %v172_v42 }
 0x112   :  { %489 = vmatmul.mubr.f32.vlgmr.msra.gmra.mrb[0].mxu1 %v187_v44 }
 0x1e5   :  { %v255_v49 = vpop.f32.mrb[0].mxu1 }
 0x1e6   :  { %v256_v50 = vadd.f32 %v362_v48, %v255_v49  ;;  %v490_v51 = vpop.f32.mrb[1].mxu1 }
 0x1e8   :  { %v259_v52 = vmax.f32 %v256_v50, 0.0 }
 0x1ea   :  { %524 = vmatmul.mubr.f32.vlgmr.msra.gmra.mrb[4].mxu0 %v259_v52 }
 0x2bd   :  { %v330_v54 = vpop.f32.mrb[4].mxu0 }
 0x2be   :  { %v331_v55 = vadd.f32 %v363_v53, %v330_v54  ;;  %v525_v56 = vpop.f32.mrb[5].mxu0 }
 0x2c0   :  { %v335_v57 = vsel %vm334_vm2, %v331_v55, -inf }
 0x2c1   :  { %336 = vmax.xlane.f32.xlu0 %v335_v57 }
 0x34e   :  { %v337_v58 = vpop.xlane.xlu0 %336 }
 0x34f   :  { %v338_v59 = vsub.f32 %v331_v55, %v337_v58 }
 0x351   :  { %v339_v60 = vmul.f32 1.442695, %v338_v59 }
 0x353   :  { %610 = vpow2.f32 %v339_v60 }
 0x35d   :  { %v611_v61 = vpop.eup %610 }
 0x35e   :  { %v341_v62 = vsel %vm334_vm2, %v611_v61, 0.0 }
 0x35f   :  { %342 = vadd.xlane.f32.xlu0 %v341_v62 }
 0x3ec   :  { %v343_v63 = vpop.xlane.xlu0 %342 }
 0x3ed   :  { %612 = vrcp.f32 %v343_v63 }
 0x3f7   :  { %v613_v0 = vpop.eup %612 }
 0x3f8   :  { %v345_v1 = vmul.f32 %v613_v0, %v611_v61 }
 0x3fa   :  { %346 = vst [vmem:[#allocation2] sm:$0x3] %v345_v1 }
 0x3fb   :  { %625 = shalt.err (!%p622_p4)
}
 0x3fc   :  { %s626_s12 = scalar_lea.hbm %s858_s2, 32 }
 0x3fd   :  { %p627_p5 = scmp.ne.s32.totalorder %s858_s2, %s626_s12  ;;  %p630_p6 = scmp.lt.u32.totalorder %s626_s12, %s858_s2 }
 0x3ff   :  { %p632_p7 = pnand %p630_p6, %p627_p5 }
 0x401   :  { %635 = shalt.err (!%p632_p7)
}
 0x402   :  { %356 = dma.vmem_to_hbm [thread:$0]  %s354_s9, 32, %s858_s2, [#allocation3]  }
 0x403   :  { %636 = dma.done.wait [#allocation3], 32  }
 0x404   :  { %637 = vsyncadd [#allocation3], 4294967264 }
 0x405   :  { %360 = vsyncpa [#allocation3], 1 }

</bundles_post_ra>
